<compile_context>
chip_gen: v5e
topology: v5e:2x2
jax: 0.10.0
libtpu: 0.0.40
codegen_flags: <defaults>
</compile_context>

<pallas_src>
import jax
import jax.numpy as jnp
from jax.experimental import pallas as pl
from jax.experimental.pallas import tpu as pltpu


def _fullbatchnorm_kernel(x_ref, stats_ref, o_ref):
    # stats_ref: [2, D_lane] — row 0 = mean, row 1 = inv_std (resident across grid).
    mean = stats_ref[0:1, :]
    inv_std = stats_ref[1:2, :]
    o_ref[...] = (x_ref[...] - mean) * inv_std


def _round_up(a, b):
    return (a + b - 1) // b * b


def full_batch_norm(x, mean, inv_std):
    """(x - mean) * inv_std, broadcasting [D] stats over the leading axes of x."""
    orig_shape = x.shape
    D = orig_shape[-1]
    x2 = x.reshape(-1, D)
    N = x2.shape[0]

    dtype = x.dtype
    itemsize = jnp.dtype(dtype).itemsize
    # Sublane multiple for this dtype: 8 for f32, 16 for bf16, 32 for 1-byte types.
    sublane = max(8, (4 // itemsize) * 8)

    mean = mean.astype(dtype)
    inv_std = inv_std.astype(dtype)

    # Lane-dense repack when the feature axis is narrower than a full lane row.
    if D < 128 and 128 % D == 0:
        pack = 128 // D
        n_packed = _round_up(N, pack) // pack
        D_lane = 128
        mean_lane = jnp.tile(mean, pack)
        inv_std_lane = jnp.tile(inv_std, pack)
    else:
        # D >= 128 (or awkward D): use the full feature axis as the last block dim.
        pack = 1
        n_packed = N
        D_lane = D
        mean_lane = mean
        inv_std_lane = inv_std

    # Tile the packed row axis: ~3 MiB per x block => ~12 MiB double-buffered
    # in+out footprint (safe on v5e/v6e/v7x default scoped VMEM limits).
    budget_rows = max(sublane, (3 << 20) // (D_lane * itemsize))
    budget_rows = (budget_rows // sublane) * sublane
    tile_n = min(_round_up(n_packed, sublane), budget_rows, 2048)
    rows_total = _round_up(n_packed, tile_n)

    # Zero-pad the row axis so the grid divides evenly, then present the
    # lane-dense [rows_total, D_lane] slab to the kernel.
    n_rows_in = rows_total * pack
    if n_rows_in != N:
        x2 = jnp.pad(x2, ((0, n_rows_in - N), (0, 0)))
    x_lane = x2.reshape(rows_total, D_lane)

    stats = jnp.stack([mean_lane, inv_std_lane], axis=0)  # [2, D_lane]

    grid = (rows_total // tile_n,)
    flops = 2 * N * D
    bytes_accessed = 2 * N * D * itemsize + 2 * D * itemsize

    out_lane = pl.pallas_call(
        _fullbatchnorm_kernel,
        out_shape=jax.ShapeDtypeStruct((rows_total, D_lane), dtype),
        grid_spec=pltpu.PrefetchScalarGridSpec(
            num_scalar_prefetch=0,
            grid=grid,
            in_specs=[
                pl.BlockSpec((tile_n, D_lane), lambda i: (i, 0)),
                pl.BlockSpec((2, D_lane), lambda i: (0, 0)),
            ],
            out_specs=pl.BlockSpec((tile_n, D_lane), lambda i: (i, 0)),
        ),
        compiler_params=pltpu.CompilerParams(
            dimension_semantics=("parallel",),
        ),
        cost_estimate=pl.CostEstimate(
            flops=flops, transcendentals=0, bytes_accessed=bytes_accessed),
    )(x_lane, stats)

    out = out_lane.reshape(n_rows_in, D)[:N]
    return out.reshape(orig_shape)


if __name__ == "__main__":
    key = jax.random.PRNGKey(0)
    kx, kv, km = jax.random.split(key, 3)

    N, D = 8, 32  # small shapes: batch=8, hidden=32

    x = jax.random.normal(kx, (N, D), dtype=jnp.float32)
    # var must be non-negative (it comes from a dataset variance in the module)
    var = jax.random.uniform(kv, (D,), dtype=jnp.float32, minval=0.1, maxval=2.0)
    mean = jax.random.normal(km, (D,), dtype=jnp.float32)

    # Buffer precompute (matches PyTorch __init__, plain-JAX glue):
    inv_std = 1.0 / jnp.sqrt(var + 1e-5)

    out = full_batch_norm(x, mean, inv_std)
    out = jax.block_until_ready(out)

    # Reference check against plain JAX.
    ref = (x - mean[None, :]) * inv_std[None, :]
    assert out.shape == ref.shape and out.dtype == ref.dtype
    assert jnp.allclose(out, ref, atol=1e-6, rtol=1e-6)

    print("KERNEL_OK")
</pallas_src>

<mosaic_0001>
module attributes {stable_mosaic.version = 11 : i64} {
  func.func @_fullbatchnorm_kernel(%arg0: i32, %arg1: memref<8x128xf32, #tpu.memory_space<vmem>>, %arg2: memref<2x128xf32, #tpu.memory_space<vmem>>, %arg3: memref<8x128xf32, #tpu.memory_space<vmem>>) attributes {dimension_semantics = [#tpu.dimension_semantics<parallel>], iteration_bounds = array<i64: 1>, scalar_prefetch = 0 : i64, scratch_operands = 0 : i64, tpu.core_type = #tpu.core_type<tc>, window_params = [{transform_indices = @transform_0, window_bounds = array<i64: 8, 128>}, {pipeline_mode = #tpu.pipeline_mode<synchronous>, transform_indices = @transform_1, window_bounds = array<i64: 2, 128>}, {transform_indices = @transform_2, window_bounds = array<i64: 8, 128>}]} {
    %c0 = arith.constant 0 : index
    %c0_0 = arith.constant 0 : index
    %0 = vector.load %arg2[%c0, %c0_0] : memref<2x128xf32, #tpu.memory_space<vmem>>, vector<1x128xf32>
    %c1 = arith.constant 1 : index
    %c0_1 = arith.constant 0 : index
    %1 = vector.load %arg2[%c1, %c0_1] : memref<2x128xf32, #tpu.memory_space<vmem>>, vector<1x128xf32>
    %c0_2 = arith.constant 0 : index
    %c0_3 = arith.constant 0 : index
    %2 = vector.load %arg1[%c0_2, %c0_3] : memref<8x128xf32, #tpu.memory_space<vmem>>, vector<8x128xf32>
    %3 = vector.broadcast %0 : vector<1x128xf32> to vector<8x128xf32>
    %4 = arith.subf %2, %3 : vector<8x128xf32>
    %5 = vector.broadcast %1 : vector<1x128xf32> to vector<8x128xf32>
    %6 = arith.mulf %4, %5 : vector<8x128xf32>
    %c0_4 = arith.constant 0 : index
    %c0_5 = arith.constant 0 : index
    %7 = vector.load %arg3[%c0_4, %c0_5] : memref<8x128xf32, #tpu.memory_space<vmem>>, vector<8x128xf32>
    tpu.vector_store %arg3[%c0_4, %c0_5], %6 {strides = array<i32>} : memref<8x128xf32, #tpu.memory_space<vmem>>, vector<8x128xf32>,
    return
  }
  func.func @transform_0(%arg0: i32) -> (i32, i32) {
    %c0_i32 = arith.constant 0 : i32
    %c0_i32_0 = arith.constant 0 : i32
    return %arg0, %c0_i32 : i32, i32
  }
  func.func @transform_1(%arg0: i32) -> (i32, i32) {
    %c0_i32 = arith.constant 0 : i32
    %c0_i32_0 = arith.constant 0 : i32
    %c0_i32_1 = arith.constant 0 : i32
    return %c0_i32, %c0_i32_0 : i32, i32
  }
  func.func @transform_2(%arg0: i32) -> (i32, i32) {
    %c0_i32 = arith.constant 0 : i32
    %c0_i32_0 = arith.constant 0 : i32
    return %arg0, %c0_i32 : i32, i32
  }
}

</mosaic_0001>

<bundles_post_ra>
// kernel: tpu_custom_call.1
= control target key start
LH: loop header
LB: loop body
LE: loop exit
PB: predicated region body
PF: predicated region fallthrough
CT: control target
= control target key end

     0   :  { %7 = vsyncpa [#allocation3], 0  ;;  %s176_s0 = inlined_call_operand.hbm [shape: f32[8,128], index: 0, kind: input, shape index: {}]   ;;  %s177_s1 = inlined_call_operand.hbm [shape: f32[2,128], index: 1, kind: input, shape index: {}]   ;;  %s178_s2 = inlined_call_operand.hbm [shape: f32[8,128], index: 2, kind: output, shape index: {}]  }
   0x1   :  { %8 = vsyncpa [#allocation6], 0 }
   0x2   :  { %9 = vsyncpa [#allocation4], 0  ;;  %s15_s11 = sshll.u32 %s176_s0, 4  ;;  %s149_s12 = smov [#allocation2]   ;;  %s16_s11 = int_to_ptr.hbm [resolvable:$true] %s15_s11 }
   0x3   :  { %s17_s13 = sshll.u32 %s149_s12, 4  ;;  %s26_s16 = sshll.u32 %s177_s1, 4  ;;  %s18_s13 = int_to_ptr.vmem [resolvable:$true] %s17_s13  ;;  %s27_s16 = int_to_ptr.hbm [resolvable:$true] %s26_s16 }
   0x4   :  { %20 = dma.hbm_to_vmem [thread:$0]  %s16_s11, 128, %s18_s13, [#allocation3]  }
   0x5   :  { %s150_s17 = smov [#allocation5]  }
   0x6   :  { %s28_s18 = sshll.u32 %s150_s17, 4  ;;  %s29_s18 = int_to_ptr.vmem [resolvable:$true] %s28_s18 }
   0x7   :  { %31 = dma.hbm_to_vmem [thread:$0]  %s27_s16, 32, %s29_s18, [#allocation6]  }
   0x8   :  { %143 = dma.done.wait [#allocation3], 128  }
   0x9   :  { %144 = vsyncadd [#allocation3], 4294967168 }
   0xa   :  { %145 = dma.done.wait [#allocation6], 32  }
   0xb   :  { %146 = vsyncadd [#allocation6], 4294967264  ;;  %v42_v0 = vld [vmem:[#allocation2] sm:$0xff]  ;;  %v69_v1 = vld [vmem:[#allocation5] ss:$0 sm:$0xff]  ;;  %s151_s0 = smov [#allocation7]  }
   0xc   :  { %v70_v2 = vld [vmem:[#allocation5 + $0x1] ss:$0 sm:$0xff]  ;;  %s53_s19 = sshll.u32 %s151_s0, 4  ;;  %s55_s22 = sshll.u32 %s178_s2, 4  ;;  %v44_v3 = vsub.f32 %v42_v0, %v69_v1  ;;  %s54_s19 = int_to_ptr.vmem [resolvable:$true] %s53_s19  ;;  %s56_s22 = int_to_ptr.hbm [resolvable:$true] %s55_s22 }
   0xe   :  { %v46_v4 = vmul.f32 %v70_v2, %v44_v3 }
  0x10   :  { %47 = vst [vmem:[#allocation7] sm:$0xff] %v46_v4 }
  0x11   :  { %58 = dma.vmem_to_hbm [thread:$0]  %s54_s19, 128, %s56_s22, [#allocation4]  }
  0x12   :  { %147 = dma.done.wait [#allocation4], 128  }
  0x13   :  { %148 = vsyncadd [#allocation4], 4294967168 }
  0x14   :  { %63 = vsyncpa [#allocation3], 1 }
  0x15   :  { %64 = vsyncpa [#allocation6], 1 }
  0x16   :  { %65 = vsyncpa [#allocation4], 1 }

</bundles_post_ra>
